<compile_context>
chip_gen: v7x
topology: tpu7x:2x2x1
jax: 0.10.0
libtpu: 0.0.40
codegen_flags: <defaults>
</compile_context>

<pallas_src>
import functools

import jax
import jax.numpy as jnp
from jax import lax
from jax.experimental import pallas as pl
from jax.experimental.pallas import tpu as pltpu

LANES = 128


def _round_up(x: int, m: int) -> int:
    return ((x + m - 1) // m) * m


def _mlp_kernel(x_ref, w0_ref, b0_ref, w1_ref, b1_ref, o_ref):
    """Dense-blocked MLP tile.

    x_ref : [F, TILE_R, 128]  VMEM  (x_ref[f, r, l] = x[r*128 + l, f])
    w0_ref: [F*H]             SMEM  (row-major [F, H] flattened)
    b0_ref: [H]               SMEM
    w1_ref: [H]               SMEM
    b1_ref: [1]               SMEM
    o_ref : [TILE_R, 128]     VMEM  (dense output)
    """
    n_features, tile_r, _ = x_ref.shape
    hidden = b0_ref.shape[0]

    # Rows per sub-chunk: keeps the live vreg working set to ~F + 2 vregs so
    # the unrolled FMA chain never spills, even for large tiles.
    rsub = tile_r if tile_r <= 8 else 8
    n_chunks = tile_r // rsub  # wrapper guarantees divisibility

    def compute_chunk(r0):
        # Load the F feature planes of this sub-chunk once; reuse across all
        # hidden units (F vector loads per chunk instead of F*H).
        xs = [x_ref[f, pl.ds(r0, rsub), :] for f in range(n_features)]
        y = jnp.full((rsub, LANES), b1_ref[0], dtype=jnp.float32)
        for j in range(hidden):
            h = jnp.full((rsub, LANES), b0_ref[j], dtype=jnp.float32)
            for f in range(n_features):
                h = h + w0_ref[f * hidden + j] * xs[f]
            # ReLU(dense0 unit j) folded straight into the dense1 accumulation.
            y = y + w1_ref[j] * jnp.maximum(h, 0.0)
        o_ref[pl.ds(r0, rsub), :] = jnp.maximum(y, 0.0).astype(o_ref.dtype)

    if n_chunks <= 4:
        for s in range(n_chunks):          # small tiles: fully unrolled
            compute_chunk(s * rsub)
    else:
        def body(s, carry):
            compute_chunk(pl.multiple_of(s * rsub, rsub))
            return carry
        lax.fori_loop(0, n_chunks, body, 0)


def mlp_forward_blocked(x_blk, w0_flat, b0, w1_flat, b1, *, tile_r: int):
    """Run the kernel on a pre-blocked input.

    x_blk: [F, R_TOTAL, 128] with x_blk[f, r, l] = x[r*128 + l, f].
    Returns [R_TOTAL, 128] with out[r, l] = y[r*128 + l].
    """
    n_features, r_total, lanes = x_blk.shape
    assert lanes == LANES
    assert r_total % tile_r == 0
    hidden = b0.shape[0]
    grid = (r_total // tile_r,)

    param_bytes = (w0_flat.size + b0.size + w1_flat.size + b1.size) * 4
    cost = pl.CostEstimate(
        flops=2 * r_total * LANES * (n_features * hidden + hidden),
        transcendentals=0,
        bytes_accessed=r_total * LANES * (n_features + 1) * 4 + param_bytes,
    )

    return pl.pallas_call(
        _mlp_kernel,
        out_shape=jax.ShapeDtypeStruct((r_total, LANES), x_blk.dtype),
        grid=grid,
        in_specs=[
            # x tile: [F, TILE_R, 128], fully dense, double-buffered across the grid.
            pl.BlockSpec((n_features, tile_r, LANES), lambda i: (0, i, 0)),
            # Weights/biases: tiny, resident in SMEM for the whole kernel.
            pl.BlockSpec(memory_space=pltpu.SMEM),  # w0 flat [F*H]
            pl.BlockSpec(memory_space=pltpu.SMEM),  # b0 [H]
            pl.BlockSpec(memory_space=pltpu.SMEM),  # w1 [H]
            pl.BlockSpec(memory_space=pltpu.SMEM),  # b1 [1]
        ],
        # Dense (lane- AND sublane-dense) output tile.
        out_specs=pl.BlockSpec((tile_r, LANES), lambda i: (i, 0)),
        compiler_params=pltpu.CompilerParams(
            dimension_semantics=("parallel",),
            vmem_limit_bytes=32 * 1024 * 1024,
        ),
        cost_estimate=cost,
    )(x_blk, w0_flat, b0, w1_flat, b1)


@functools.partial(jax.jit, static_argnames=("tile_r_max",))
def test_module_forward(x, w0, b0, w1, b1, *, tile_r_max: int = 256):
    """x: [B, F] float32; w0: [F, 5]; b0: [5]; w1: [5, 1]; b1: [1] -> [B, 1]."""
    B, F = x.shape

    r_needed = pl.cdiv(max(B, 1), LANES)
    if r_needed <= 8 and r_needed <= tile_r_max:
        tile_r = r_needed                       # single block, equals full dim
    else:
        tile_r = min(_round_up(r_needed, 8), max(8, (tile_r_max // 8) * 8))
    r_total = _round_up(r_needed, tile_r)
    b_pad = r_total * LANES

    # Minimal padding + one fused relayout pass: [B, F] -> [F, R_TOTAL, 128].
    # A producer that already stores activations in this layout should call
    # mlp_forward_blocked() directly and skip this pass.
    x_p = x if b_pad == B else jnp.pad(x, ((0, b_pad - B), (0, 0)))
    x_blk = x_p.reshape(r_total, LANES, F).transpose(2, 0, 1)

    out = mlp_forward_blocked(
        x_blk, w0.reshape(-1), b0, w1.reshape(-1), b1, tile_r=tile_r
    )

    # Back to the module's [B, 1] layout (drop batch padding).
    return out.reshape(b_pad)[:B].reshape(B, 1)


def init_params(key, n_features):
    """Deterministic init mimicking torch.nn.Linear's U(-1/sqrt(fan_in), 1/sqrt(fan_in))."""
    k0, k1, k2, k3 = jax.random.split(key, 4)
    bound0 = 1.0 / jnp.sqrt(jnp.float32(n_features))
    bound1 = 1.0 / jnp.sqrt(jnp.float32(5))
    # Stored as [in, out] (transposed vs PyTorch's [out, in]).
    w0 = jax.random.uniform(k0, (n_features, 5), jnp.float32, -bound0, bound0)
    b0 = jax.random.uniform(k1, (5,), jnp.float32, -bound0, bound0)
    w1 = jax.random.uniform(k2, (5, 1), jnp.float32, -bound1, bound1)
    b1 = jax.random.uniform(k3, (1,), jnp.float32, -bound1, bound1)
    return w0, b0, w1, b1


def _reference(x, w0, b0, w1, b1):
    return jnp.maximum(jnp.maximum(x @ w0 + b0, 0.0) @ w1 + b1, 0.0)


if __name__ == "__main__":
    key = jax.random.PRNGKey(0)
    kx, kp, kx2, kx3 = jax.random.split(key, 4)

    n_features = 10
    w0, b0, w1, b1 = init_params(kp, n_features)

    # 1) Small case matching the module's typical streaming use (B=2): single tiny block.
    x_small = jax.random.normal(kx, (2, n_features), jnp.float32)
    out_small = jax.block_until_ready(test_module_forward(x_small, w0, b0, w1, b1))
    ref_small = _reference(x_small, w0, b0, w1, b1)
    assert out_small.shape == (2, 1)
    assert jnp.allclose(out_small, ref_small, atol=1e-5, rtol=1e-5)

    # 2) Medium case with default tiling: exercises the in-kernel sub-chunk loop.
    x_med = jax.random.normal(kx2, (6000, n_features), jnp.float32)
    out_med = jax.block_until_ready(test_module_forward(x_med, w0, b0, w1, b1))
    ref_med = _reference(x_med, w0, b0, w1, b1)
    assert out_med.shape == (6000, 1)
    assert jnp.allclose(out_med, ref_med, atol=1e-5, rtol=1e-5)

    # 3) Small tile cap: exercises a multi-step grid + batch padding.
    x_big = jax.random.normal(kx3, (2500, n_features), jnp.float32)
    out_big = jax.block_until_ready(
        test_module_forward(x_big, w0, b0, w1, b1, tile_r_max=8)
    )
    ref_big = _reference(x_big, w0, b0, w1, b1)
    assert out_big.shape == (2500, 1)
    assert jnp.allclose(out_big, ref_big, atol=1e-5, rtol=1e-5)

    print("KERNEL_OK")
</pallas_src>

<mosaic_0001>
module attributes {stable_mosaic.version = 11 : i64} {
  func.func @_mlp_kernel(%arg0: i32, %arg1: memref<10x1x128xf32, #tpu.memory_space<vmem>>, %arg2: memref<50xf32, #tpu.memory_space<smem>>, %arg3: memref<5xf32, #tpu.memory_space<smem>>, %arg4: memref<5xf32, #tpu.memory_space<smem>>, %arg5: memref<1xf32, #tpu.memory_space<smem>>, %arg6: memref<1x128xf32, #tpu.memory_space<vmem>>) attributes {dimension_semantics = [#tpu.dimension_semantics<parallel>], iteration_bounds = array<i64: 1>, scalar_prefetch = 0 : i64, scratch_operands = 0 : i64, tpu.core_type = #tpu.core_type<tc>, window_params = [{transform_indices = @transform_0, window_bounds = array<i64: 10, 1, 128>}, {transform_indices = @transform_1, window_bounds = array<i64: 50>}, {transform_indices = @transform_2, window_bounds = array<i64: 5>}, {transform_indices = @transform_3, window_bounds = array<i64: 5>}, {transform_indices = @transform_4, window_bounds = array<i64: 1>}, {transform_indices = @transform_5, window_bounds = array<i64: 1, 128>}]} {
    %c0 = arith.constant 0 : index
    %c0_0 = arith.constant 0 : index
    %c0_1 = arith.constant 0 : index
    %0 = vector.load %arg1[%c0, %c0_0, %c0_1] : memref<10x1x128xf32, #tpu.memory_space<vmem>>, vector<1x1x128xf32>
    %1 = vector.shape_cast %0 : vector<1x1x128xf32> to vector<1x128xf32>
    %c1 = arith.constant 1 : index
    %c0_2 = arith.constant 0 : index
    %c0_3 = arith.constant 0 : index
    %2 = vector.load %arg1[%c1, %c0_2, %c0_3] : memref<10x1x128xf32, #tpu.memory_space<vmem>>, vector<1x1x128xf32>
    %3 = vector.shape_cast %2 : vector<1x1x128xf32> to vector<1x128xf32>
    %c2 = arith.constant 2 : index
    %c0_4 = arith.constant 0 : index
    %c0_5 = arith.constant 0 : index
    %4 = vector.load %arg1[%c2, %c0_4, %c0_5] : memref<10x1x128xf32, #tpu.memory_space<vmem>>, vector<1x1x128xf32>
    %5 = vector.shape_cast %4 : vector<1x1x128xf32> to vector<1x128xf32>
    %c3 = arith.constant 3 : index
    %c0_6 = arith.constant 0 : index
    %c0_7 = arith.constant 0 : index
    %6 = vector.load %arg1[%c3, %c0_6, %c0_7] : memref<10x1x128xf32, #tpu.memory_space<vmem>>, vector<1x1x128xf32>
    %7 = vector.shape_cast %6 : vector<1x1x128xf32> to vector<1x128xf32>
    %c4 = arith.constant 4 : index
    %c0_8 = arith.constant 0 : index
    %c0_9 = arith.constant 0 : index
    %8 = vector.load %arg1[%c4, %c0_8, %c0_9] : memref<10x1x128xf32, #tpu.memory_space<vmem>>, vector<1x1x128xf32>
    %9 = vector.shape_cast %8 : vector<1x1x128xf32> to vector<1x128xf32>
    %c5 = arith.constant 5 : index
    %c0_10 = arith.constant 0 : index
    %c0_11 = arith.constant 0 : index
    %10 = vector.load %arg1[%c5, %c0_10, %c0_11] : memref<10x1x128xf32, #tpu.memory_space<vmem>>, vector<1x1x128xf32>
    %11 = vector.shape_cast %10 : vector<1x1x128xf32> to vector<1x128xf32>
    %c6 = arith.constant 6 : index
    %c0_12 = arith.constant 0 : index
    %c0_13 = arith.constant 0 : index
    %12 = vector.load %arg1[%c6, %c0_12, %c0_13] : memref<10x1x128xf32, #tpu.memory_space<vmem>>, vector<1x1x128xf32>
    %13 = vector.shape_cast %12 : vector<1x1x128xf32> to vector<1x128xf32>
    %c7 = arith.constant 7 : index
    %c0_14 = arith.constant 0 : index
    %c0_15 = arith.constant 0 : index
    %14 = vector.load %arg1[%c7, %c0_14, %c0_15] : memref<10x1x128xf32, #tpu.memory_space<vmem>>, vector<1x1x128xf32>
    %15 = vector.shape_cast %14 : vector<1x1x128xf32> to vector<1x128xf32>
    %c8 = arith.constant 8 : index
    %c0_16 = arith.constant 0 : index
    %c0_17 = arith.constant 0 : index
    %16 = vector.load %arg1[%c8, %c0_16, %c0_17] : memref<10x1x128xf32, #tpu.memory_space<vmem>>, vector<1x1x128xf32>
    %17 = vector.shape_cast %16 : vector<1x1x128xf32> to vector<1x128xf32>
    %c9 = arith.constant 9 : index
    %c0_18 = arith.constant 0 : index
    %c0_19 = arith.constant 0 : index
    %18 = vector.load %arg1[%c9, %c0_18, %c0_19] : memref<10x1x128xf32, #tpu.memory_space<vmem>>, vector<1x1x128xf32>
    %19 = vector.shape_cast %18 : vector<1x1x128xf32> to vector<1x128xf32>
    %c0_20 = arith.constant 0 : index
    %20 = memref.load %arg5[%c0_20] : memref<1xf32, #tpu.memory_space<smem>>
    %21 = vector.broadcast %20 : f32 to vector<1x128xf32>
    %c0_21 = arith.constant 0 : index
    %22 = memref.load %arg3[%c0_21] : memref<5xf32, #tpu.memory_space<smem>>
    %23 = vector.broadcast %22 : f32 to vector<1x128xf32>
    %c0_22 = arith.constant 0 : index
    %24 = memref.load %arg2[%c0_22] : memref<50xf32, #tpu.memory_space<smem>>
    %25 = vector.broadcast %24 : f32 to vector<1x128xf32>
    %26 = arith.mulf %25, %1 : vector<1x128xf32>
    %27 = arith.addf %23, %26 : vector<1x128xf32>
    %c5_23 = arith.constant 5 : index
    %28 = memref.load %arg2[%c5_23] : memref<50xf32, #tpu.memory_space<smem>>
    %29 = vector.broadcast %28 : f32 to vector<1x128xf32>
    %30 = arith.mulf %29, %3 : vector<1x128xf32>
    %31 = arith.addf %27, %30 : vector<1x128xf32>
    %c10 = arith.constant 10 : index
    %32 = memref.load %arg2[%c10] : memref<50xf32, #tpu.memory_space<smem>>
    %33 = vector.broadcast %32 : f32 to vector<1x128xf32>
    %34 = arith.mulf %33, %5 : vector<1x128xf32>
    %35 = arith.addf %31, %34 : vector<1x128xf32>
    %c15 = arith.constant 15 : index
    %36 = memref.load %arg2[%c15] : memref<50xf32, #tpu.memory_space<smem>>
    %37 = vector.broadcast %36 : f32 to vector<1x128xf32>
    %38 = arith.mulf %37, %7 : vector<1x128xf32>
    %39 = arith.addf %35, %38 : vector<1x128xf32>
    %c20 = arith.constant 20 : index
    %40 = memref.load %arg2[%c20] : memref<50xf32, #tpu.memory_space<smem>>
    %41 = vector.broadcast %40 : f32 to vector<1x128xf32>
    %42 = arith.mulf %41, %9 : vector<1x128xf32>
    %43 = arith.addf %39, %42 : vector<1x128xf32>
    %c25 = arith.constant 25 : index
    %44 = memref.load %arg2[%c25] : memref<50xf32, #tpu.memory_space<smem>>
    %45 = vector.broadcast %44 : f32 to vector<1x128xf32>
    %46 = arith.mulf %45, %11 : vector<1x128xf32>
    %47 = arith.addf %43, %46 : vector<1x128xf32>
    %c30 = arith.constant 30 : index
    %48 = memref.load %arg2[%c30] : memref<50xf32, #tpu.memory_space<smem>>
    %49 = vector.broadcast %48 : f32 to vector<1x128xf32>
    %50 = arith.mulf %49, %13 : vector<1x128xf32>
    %51 = arith.addf %47, %50 : vector<1x128xf32>
    %c35 = arith.constant 35 : index
    %52 = memref.load %arg2[%c35] : memref<50xf32, #tpu.memory_space<smem>>
    %53 = vector.broadcast %52 : f32 to vector<1x128xf32>
    %54 = arith.mulf %53, %15 : vector<1x128xf32>
    %55 = arith.addf %51, %54 : vector<1x128xf32>
    %c40 = arith.constant 40 : index
    %56 = memref.load %arg2[%c40] : memref<50xf32, #tpu.memory_space<smem>>
    %57 = vector.broadcast %56 : f32 to vector<1x128xf32>
    %58 = arith.mulf %57, %17 : vector<1x128xf32>
    %59 = arith.addf %55, %58 : vector<1x128xf32>
    %c45 = arith.constant 45 : index
    %60 = memref.load %arg2[%c45] : memref<50xf32, #tpu.memory_space<smem>>
    %61 = vector.broadcast %60 : f32 to vector<1x128xf32>
    %62 = arith.mulf %61, %19 : vector<1x128xf32>
    %63 = arith.addf %59, %62 : vector<1x128xf32>
    %c0_24 = arith.constant 0 : index
    %64 = memref.load %arg4[%c0_24] : memref<5xf32, #tpu.memory_space<smem>>
    %cst = arith.constant 0.000000e+00 : f32
    %65 = vector.broadcast %cst : f32 to vector<1x128xf32>
    %66 = arith.maximumf %63, %65 : vector<1x128xf32>
    %67 = vector.broadcast %64 : f32 to vector<1x128xf32>
    %68 = arith.mulf %67, %66 : vector<1x128xf32>
    %69 = arith.addf %21, %68 : vector<1x128xf32>
    %c1_25 = arith.constant 1 : index
    %70 = memref.load %arg3[%c1_25] : memref<5xf32, #tpu.memory_space<smem>>
    %71 = vector.broadcast %70 : f32 to vector<1x128xf32>
    %c1_26 = arith.constant 1 : index
    %72 = memref.load %arg2[%c1_26] : memref<50xf32, #tpu.memory_space<smem>>
    %73 = vector.broadcast %72 : f32 to vector<1x128xf32>
    %74 = arith.mulf %73, %1 : vector<1x128xf32>
    %75 = arith.addf %71, %74 : vector<1x128xf32>
    %c6_27 = arith.constant 6 : index
    %76 = memref.load %arg2[%c6_27] : memref<50xf32, #tpu.memory_space<smem>>
    %77 = vector.broadcast %76 : f32 to vector<1x128xf32>
    %78 = arith.mulf %77, %3 : vector<1x128xf32>
    %79 = arith.addf %75, %78 : vector<1x128xf32>
    %c11 = arith.constant 11 : index
    %80 = memref.load %arg2[%c11] : memref<50xf32, #tpu.memory_space<smem>>
    %81 = vector.broadcast %80 : f32 to vector<1x128xf32>
    %82 = arith.mulf %81, %5 : vector<1x128xf32>
    %83 = arith.addf %79, %82 : vector<1x128xf32>
    %c16 = arith.constant 16 : index
    %84 = memref.load %arg2[%c16] : memref<50xf32, #tpu.memory_space<smem>>
    %85 = vector.broadcast %84 : f32 to vector<1x128xf32>
    %86 = arith.mulf %85, %7 : vector<1x128xf32>
    %87 = arith.addf %83, %86 : vector<1x128xf32>
    %c21 = arith.constant 21 : index
    %88 = memref.load %arg2[%c21] : memref<50xf32, #tpu.memory_space<smem>>
    %89 = vector.broadcast %88 : f32 to vector<1x128xf32>
    %90 = arith.mulf %89, %9 : vector<1x128xf32>
    %91 = arith.addf %87, %90 : vector<1x128xf32>
    %c26 = arith.constant 26 : index
    %92 = memref.load %arg2[%c26] : memref<50xf32, #tpu.memory_space<smem>>
    %93 = vector.broadcast %92 : f32 to vector<1x128xf32>
    %94 = arith.mulf %93, %11 : vector<1x128xf32>
    %95 = arith.addf %91, %94 : vector<1x128xf32>
    %c31 = arith.constant 31 : index
    %96 = memref.load %arg2[%c31] : memref<50xf32, #tpu.memory_space<smem>>
    %97 = vector.broadcast %96 : f32 to vector<1x128xf32>
    %98 = arith.mulf %97, %13 : vector<1x128xf32>
    %99 = arith.addf %95, %98 : vector<1x128xf32>
    %c36 = arith.constant 36 : index
    %100 = memref.load %arg2[%c36] : memref<50xf32, #tpu.memory_space<smem>>
    %101 = vector.broadcast %100 : f32 to vector<1x128xf32>
    %102 = arith.mulf %101, %15 : vector<1x128xf32>
    %103 = arith.addf %99, %102 : vector<1x128xf32>
    %c41 = arith.constant 41 : index
    %104 = memref.load %arg2[%c41] : memref<50xf32, #tpu.memory_space<smem>>
    %105 = vector.broadcast %104 : f32 to vector<1x128xf32>
    %106 = arith.mulf %105, %17 : vector<1x128xf32>
    %107 = arith.addf %103, %106 : vector<1x128xf32>
    %c46 = arith.constant 46 : index
    %108 = memref.load %arg2[%c46] : memref<50xf32, #tpu.memory_space<smem>>
    %109 = vector.broadcast %108 : f32 to vector<1x128xf32>
    %110 = arith.mulf %109, %19 : vector<1x128xf32>
    %111 = arith.addf %107, %110 : vector<1x128xf32>
    %c1_28 = arith.constant 1 : index
    %112 = memref.load %arg4[%c1_28] : memref<5xf32, #tpu.memory_space<smem>>
    %cst_29 = arith.constant 0.000000e+00 : f32
    %113 = vector.broadcast %cst_29 : f32 to vector<1x128xf32>
    %114 = arith.maximumf %111, %113 : vector<1x128xf32>
    %115 = vector.broadcast %112 : f32 to vector<1x128xf32>
    %116 = arith.mulf %115, %114 : vector<1x128xf32>
    %117 = arith.addf %69, %116 : vector<1x128xf32>
    %c2_30 = arith.constant 2 : index
    %118 = memref.load %arg3[%c2_30] : memref<5xf32, #tpu.memory_space<smem>>
    %119 = vector.broadcast %118 : f32 to vector<1x128xf32>
    %c2_31 = arith.constant 2 : index
    %120 = memref.load %arg2[%c2_31] : memref<50xf32, #tpu.memory_space<smem>>
    %121 = vector.broadcast %120 : f32 to vector<1x128xf32>
    %122 = arith.mulf %121, %1 : vector<1x128xf32>
    %123 = arith.addf %119, %122 : vector<1x128xf32>
    %c7_32 = arith.constant 7 : index
    %124 = memref.load %arg2[%c7_32] : memref<50xf32, #tpu.memory_space<smem>>
    %125 = vector.broadcast %124 : f32 to vector<1x128xf32>
    %126 = arith.mulf %125, %3 : vector<1x128xf32>
    %127 = arith.addf %123, %126 : vector<1x128xf32>
    %c12 = arith.constant 12 : index
    %128 = memref.load %arg2[%c12] : memref<50xf32, #tpu.memory_space<smem>>
    %129 = vector.broadcast %128 : f32 to vector<1x128xf32>
    %130 = arith.mulf %129, %5 : vector<1x128xf32>
    %131 = arith.addf %127, %130 : vector<1x128xf32>
    %c17 = arith.constant 17 : index
    %132 = memref.load %arg2[%c17] : memref<50xf32, #tpu.memory_space<smem>>
    %133 = vector.broadcast %132 : f32 to vector<1x128xf32>
    %134 = arith.mulf %133, %7 : vector<1x128xf32>
    %135 = arith.addf %131, %134 : vector<1x128xf32>
    %c22 = arith.constant 22 : index
    %136 = memref.load %arg2[%c22] : memref<50xf32, #tpu.memory_space<smem>>
    %137 = vector.broadcast %136 : f32 to vector<1x128xf32>
    %138 = arith.mulf %137, %9 : vector<1x128xf32>
    %139 = arith.addf %135, %138 : vector<1x128xf32>
    %c27 = arith.constant 27 : index
    %140 = memref.load %arg2[%c27] : memref<50xf32, #tpu.memory_space<smem>>
    %141 = vector.broadcast %140 : f32 to vector<1x128xf32>
    %142 = arith.mulf %141, %11 : vector<1x128xf32>
    %143 = arith.addf %139, %142 : vector<1x128xf32>
    %c32 = arith.constant 32 : index
    %144 = memref.load %arg2[%c32] : memref<50xf32, #tpu.memory_space<smem>>
    %145 = vector.broadcast %144 : f32 to vector<1x128xf32>
    %146 = arith.mulf %145, %13 : vector<1x128xf32>
    %147 = arith.addf %143, %146 : vector<1x128xf32>
    %c37 = arith.constant 37 : index
    %148 = memref.load %arg2[%c37] : memref<50xf32, #tpu.memory_space<smem>>
    %149 = vector.broadcast %148 : f32 to vector<1x128xf32>
    %150 = arith.mulf %149, %15 : vector<1x128xf32>
    %151 = arith.addf %147, %150 : vector<1x128xf32>
    %c42 = arith.constant 42 : index
    %152 = memref.load %arg2[%c42] : memref<50xf32, #tpu.memory_space<smem>>
    %153 = vector.broadcast %152 : f32 to vector<1x128xf32>
    %154 = arith.mulf %153, %17 : vector<1x128xf32>
    %155 = arith.addf %151, %154 : vector<1x128xf32>
    %c47 = arith.constant 47 : index
    %156 = memref.load %arg2[%c47] : memref<50xf32, #tpu.memory_space<smem>>
    %157 = vector.broadcast %156 : f32 to vector<1x128xf32>
    %158 = arith.mulf %157, %19 : vector<1x128xf32>
    %159 = arith.addf %155, %158 : vector<1x128xf32>
    %c2_33 = arith.constant 2 : index
    %160 = memref.load %arg4[%c2_33] : memref<5xf32, #tpu.memory_space<smem>>
    %cst_34 = arith.constant 0.000000e+00 : f32
    %161 = vector.broadcast %cst_34 : f32 to vector<1x128xf32>
    %162 = arith.maximumf %159, %161 : vector<1x128xf32>
    %163 = vector.broadcast %160 : f32 to vector<1x128xf32>
    %164 = arith.mulf %163, %162 : vector<1x128xf32>
    %165 = arith.addf %117, %164 : vector<1x128xf32>
    %c3_35 = arith.constant 3 : index
    %166 = memref.load %arg3[%c3_35] : memref<5xf32, #tpu.memory_space<smem>>
    %167 = vector.broadcast %166 : f32 to vector<1x128xf32>
    %c3_36 = arith.constant 3 : index
    %168 = memref.load %arg2[%c3_36] : memref<50xf32, #tpu.memory_space<smem>>
    %169 = vector.broadcast %168 : f32 to vector<1x128xf32>
    %170 = arith.mulf %169, %1 : vector<1x128xf32>
    %171 = arith.addf %167, %170 : vector<1x128xf32>
    %c8_37 = arith.constant 8 : index
    %172 = memref.load %arg2[%c8_37] : memref<50xf32, #tpu.memory_space<smem>>
    %173 = vector.broadcast %172 : f32 to vector<1x128xf32>
    %174 = arith.mulf %173, %3 : vector<1x128xf32>
    %175 = arith.addf %171, %174 : vector<1x128xf32>
    %c13 = arith.constant 13 : index
    %176 = memref.load %arg2[%c13] : memref<50xf32, #tpu.memory_space<smem>>
    %177 = vector.broadcast %176 : f32 to vector<1x128xf32>
    %178 = arith.mulf %177, %5 : vector<1x128xf32>
    %179 = arith.addf %175, %178 : vector<1x128xf32>
    %c18 = arith.constant 18 : index
    %180 = memref.load %arg2[%c18] : memref<50xf32, #tpu.memory_space<smem>>
    %181 = vector.broadcast %180 : f32 to vector<1x128xf32>
    %182 = arith.mulf %181, %7 : vector<1x128xf32>
    %183 = arith.addf %179, %182 : vector<1x128xf32>
    %c23 = arith.constant 23 : index
    %184 = memref.load %arg2[%c23] : memref<50xf32, #tpu.memory_space<smem>>
    %185 = vector.broadcast %184 : f32 to vector<1x128xf32>
    %186 = arith.mulf %185, %9 : vector<1x128xf32>
    %187 = arith.addf %183, %186 : vector<1x128xf32>
    %c28 = arith.constant 28 : index
    %188 = memref.load %arg2[%c28] : memref<50xf32, #tpu.memory_space<smem>>
    %189 = vector.broadcast %188 : f32 to vector<1x128xf32>
    %190 = arith.mulf %189, %11 : vector<1x128xf32>
    %191 = arith.addf %187, %190 : vector<1x128xf32>
    %c33 = arith.constant 33 : index
    %192 = memref.load %arg2[%c33] : memref<50xf32, #tpu.memory_space<smem>>
    %193 = vector.broadcast %192 : f32 to vector<1x128xf32>
    %194 = arith.mulf %193, %13 : vector<1x128xf32>
    %195 = arith.addf %191, %194 : vector<1x128xf32>
    %c38 = arith.constant 38 : index
    %196 = memref.load %arg2[%c38] : memref<50xf32, #tpu.memory_space<smem>>
    %197 = vector.broadcast %196 : f32 to vector<1x128xf32>
    %198 = arith.mulf %197, %15 : vector<1x128xf32>
    %199 = arith.addf %195, %198 : vector<1x128xf32>
    %c43 = arith.constant 43 : index
    %200 = memref.load %arg2[%c43] : memref<50xf32, #tpu.memory_space<smem>>
    %201 = vector.broadcast %200 : f32 to vector<1x128xf32>
    %202 = arith.mulf %201, %17 : vector<1x128xf32>
    %203 = arith.addf %199, %202 : vector<1x128xf32>
    %c48 = arith.constant 48 : index
    %204 = memref.load %arg2[%c48] : memref<50xf32, #tpu.memory_space<smem>>
    %205 = vector.broadcast %204 : f32 to vector<1x128xf32>
    %206 = arith.mulf %205, %19 : vector<1x128xf32>
    %207 = arith.addf %203, %206 : vector<1x128xf32>
    %c3_38 = arith.constant 3 : index
    %208 = memref.load %arg4[%c3_38] : memref<5xf32, #tpu.memory_space<smem>>
    %cst_39 = arith.constant 0.000000e+00 : f32
    %209 = vector.broadcast %cst_39 : f32 to vector<1x128xf32>
    %210 = arith.maximumf %207, %209 : vector<1x128xf32>
    %211 = vector.broadcast %208 : f32 to vector<1x128xf32>
    %212 = arith.mulf %211, %210 : vector<1x128xf32>
    %213 = arith.addf %165, %212 : vector<1x128xf32>
    %c4_40 = arith.constant 4 : index
    %214 = memref.load %arg3[%c4_40] : memref<5xf32, #tpu.memory_space<smem>>
    %215 = vector.broadcast %214 : f32 to vector<1x128xf32>
    %c4_41 = arith.constant 4 : index
    %216 = memref.load %arg2[%c4_41] : memref<50xf32, #tpu.memory_space<smem>>
    %217 = vector.broadcast %216 : f32 to vector<1x128xf32>
    %218 = arith.mulf %217, %1 : vector<1x128xf32>
    %219 = arith.addf %215, %218 : vector<1x128xf32>
    %c9_42 = arith.constant 9 : index
    %220 = memref.load %arg2[%c9_42] : memref<50xf32, #tpu.memory_space<smem>>
    %221 = vector.broadcast %220 : f32 to vector<1x128xf32>
    %222 = arith.mulf %221, %3 : vector<1x128xf32>
    %223 = arith.addf %219, %222 : vector<1x128xf32>
    %c14 = arith.constant 14 : index
    %224 = memref.load %arg2[%c14] : memref<50xf32, #tpu.memory_space<smem>>
    %225 = vector.broadcast %224 : f32 to vector<1x128xf32>
    %226 = arith.mulf %225, %5 : vector<1x128xf32>
    %227 = arith.addf %223, %226 : vector<1x128xf32>
    %c19 = arith.constant 19 : index
    %228 = memref.load %arg2[%c19] : memref<50xf32, #tpu.memory_space<smem>>
    %229 = vector.broadcast %228 : f32 to vector<1x128xf32>
    %230 = arith.mulf %229, %7 : vector<1x128xf32>
    %231 = arith.addf %227, %230 : vector<1x128xf32>
    %c24 = arith.constant 24 : index
    %232 = memref.load %arg2[%c24] : memref<50xf32, #tpu.memory_space<smem>>
    %233 = vector.broadcast %232 : f32 to vector<1x128xf32>
    %234 = arith.mulf %233, %9 : vector<1x128xf32>
    %235 = arith.addf %231, %234 : vector<1x128xf32>
    %c29 = arith.constant 29 : index
    %236 = memref.load %arg2[%c29] : memref<50xf32, #tpu.memory_space<smem>>
    %237 = vector.broadcast %236 : f32 to vector<1x128xf32>
    %238 = arith.mulf %237, %11 : vector<1x128xf32>
    %239 = arith.addf %235, %238 : vector<1x128xf32>
    %c34 = arith.constant 34 : index
    %240 = memref.load %arg2[%c34] : memref<50xf32, #tpu.memory_space<smem>>
    %241 = vector.broadcast %240 : f32 to vector<1x128xf32>
    %242 = arith.mulf %241, %13 : vector<1x128xf32>
    %243 = arith.addf %239, %242 : vector<1x128xf32>
    %c39 = arith.constant 39 : index
    %244 = memref.load %arg2[%c39] : memref<50xf32, #tpu.memory_space<smem>>
    %245 = vector.broadcast %244 : f32 to vector<1x128xf32>
    %246 = arith.mulf %245, %15 : vector<1x128xf32>
    %247 = arith.addf %243, %246 : vector<1x128xf32>
    %c44 = arith.constant 44 : index
    %248 = memref.load %arg2[%c44] : memref<50xf32, #tpu.memory_space<smem>>
    %249 = vector.broadcast %248 : f32 to vector<1x128xf32>
    %250 = arith.mulf %249, %17 : vector<1x128xf32>
    %251 = arith.addf %247, %250 : vector<1x128xf32>
    %c49 = arith.constant 49 : index
    %252 = memref.load %arg2[%c49] : memref<50xf32, #tpu.memory_space<smem>>
    %253 = vector.broadcast %252 : f32 to vector<1x128xf32>
    %254 = arith.mulf %253, %19 : vector<1x128xf32>
    %255 = arith.addf %251, %254 : vector<1x128xf32>
    %c4_43 = arith.constant 4 : index
    %256 = memref.load %arg4[%c4_43] : memref<5xf32, #tpu.memory_space<smem>>
    %cst_44 = arith.constant 0.000000e+00 : f32
    %257 = vector.broadcast %cst_44 : f32 to vector<1x128xf32>
    %258 = arith.maximumf %255, %257 : vector<1x128xf32>
    %259 = vector.broadcast %256 : f32 to vector<1x128xf32>
    %260 = arith.mulf %259, %258 : vector<1x128xf32>
    %261 = arith.addf %213, %260 : vector<1x128xf32>
    %cst_45 = arith.constant 0.000000e+00 : f32
    %262 = vector.broadcast %cst_45 : f32 to vector<1x128xf32>
    %263 = arith.maximumf %261, %262 : vector<1x128xf32>
    %c0_46 = arith.constant 0 : index
    %c0_47 = arith.constant 0 : index
    %264 = vector.load %arg6[%c0_46, %c0_47] : memref<1x128xf32, #tpu.memory_space<vmem>>, vector<1x128xf32>
    tpu.vector_store %arg6[%c0_46, %c0_47], %263 {strides = array<i32>} : memref<1x128xf32, #tpu.memory_space<vmem>>, vector<1x128xf32>,
    return
  }
  func.func @transform_0(%arg0: i32) -> (i32, i32, i32) {
    %c0_i32 = arith.constant 0 : i32
    %c0_i32_0 = arith.constant 0 : i32
    %c0_i32_1 = arith.constant 0 : i32
    return %c0_i32, %arg0, %c0_i32_0 : i32, i32, i32
  }
  func.func @transform_1(%arg0: i32) -> i32 {
    %c0_i32 = arith.constant 0 : i32
    %c0_i32_0 = arith.constant 0 : i32
    return %c0_i32 : i32
  }
  func.func @transform_2(%arg0: i32) -> i32 {
    %c0_i32 = arith.constant 0 : i32
    %c0_i32_0 = arith.constant 0 : i32
    return %c0_i32 : i32
  }
  func.func @transform_3(%arg0: i32) -> i32 {
    %c0_i32 = arith.constant 0 : i32
    %c0_i32_0 = arith.constant 0 : i32
    return %c0_i32 : i32
  }
  func.func @transform_4(%arg0: i32) -> i32 {
    %c0_i32 = arith.constant 0 : i32
    %c0_i32_0 = arith.constant 0 : i32
    return %c0_i32 : i32
  }
  func.func @transform_5(%arg0: i32) -> (i32, i32) {
    %c0_i32 = arith.constant 0 : i32
    %c0_i32_0 = arith.constant 0 : i32
    return %arg0, %c0_i32 : i32, i32
  }
}

</mosaic_0001>

<bundles_post_ra>
// kernel: test_module_forward.1
= control target key start
LH: loop header
LB: loop body
LE: loop exit
PB: predicated region body
PF: predicated region fallthrough
CT: control target
= control target key end

     0   :  { %11 = vsyncpa [#allocation4], 0  ;;  %s737_s0 = inlined_call_operand.vmem [shape: f32[10,1,128], index: 0, kind: input, shape index: {}]   ;;  %s738_s1 = inlined_call_operand.vmem [shape: f32[50], index: 1, kind: input, shape index: {}]   ;;  %s739_s2 = inlined_call_operand.vmem [shape: f32[5], index: 2, kind: input, shape index: {}]   ;;  %s740_s3 = inlined_call_operand.vmem [shape: f32[5], index: 3, kind: input, shape index: {}]   ;;  %s741_s4 = inlined_call_operand.<no memory space> [shape: f32[1], index: 4, kind: input, shape index: {}]   ;;  %s742_s5 = inlined_call_operand.vmem [shape: f32[1,128], index: 5, kind: output, shape index: {}]  }
   0x1   :  { %12 = vsyncpa [#allocation6], 0  ;;  %s31_s20 = sshll.u32 %s739_s2, 4  ;;  %s21_s23 = sshll.u32 %s738_s1, 4  ;;  %s32_s20 = int_to_ptr.vmem [resolvable:$true] %s31_s20  ;;  %s22_s23 = int_to_ptr.vmem [resolvable:$true] %s21_s23 }
   0x2   :  { %s390_s24 = scalar_lea.vmem %s32_s20, 16  ;;  %p395_p1 = scmp.lt.s32.totalorder %s32_s20, %s32_s20 }
   0x3   :  { %p391_p0 = scmp.ne.s32.totalorder %s32_s20, %s390_s24  ;;  %p396_p2 = scmp.lt.s32.totalorder %s390_s24, %s390_s24 }
   0x5   :  { %p397_p3 = por %p396_p2, %p395_p1 }
   0x7   :  { %p398_p4 = pnand %p397_p3, %p391_p0 }
   0x9   :  { %401 = shalt.err (!%p398_p4)
}
   0xa   :  { %s430_s25 = smov [#allocation5]   ;;  %s402_s26 = scalar_lea.vmem %s22_s23, 16 }
   0xb   :  { %34 = dma.vmem_to_smem %s32_s20, 16, %s430_s25, [#allocation6]  }
   0xc   :  { %p403_p5 = scmp.ne.s32.totalorder %s22_s23, %s402_s26  ;;  %p407_p6 = scmp.lt.s32.totalorder %s22_s23, %s22_s23 }
   0xd   :  { %p408_p7 = scmp.lt.s32.totalorder %s402_s26, %s402_s26 }
   0xf   :  { %p409_p8 = por %p408_p7, %p407_p6 }
  0x11   :  { %p410_p9 = pnand %p409_p8, %p403_p5 }
  0x13   :  { %413 = shalt.err (!%p410_p9)
}
  0x14   :  { %s431_s2 = smov [#allocation3]   ;;  %s41_s28 = sshll.u32 %s740_s3, 4  ;;  %s42_s28 = int_to_ptr.vmem [resolvable:$true] %s41_s28 }
  0x15   :  { %24 = dma.vmem_to_smem %s22_s23, 16, %s431_s2, [#allocation4]  }
  0x16   :  { %s414_s29 = scalar_lea.vmem %s42_s28, 16  ;;  %p419_p11 = scmp.lt.s32.totalorder %s42_s28, %s42_s28 }
  0x17   :  { %p415_p10 = scmp.ne.s32.totalorder %s42_s28, %s414_s29  ;;  %p420_p12 = scmp.lt.s32.totalorder %s414_s29, %s414_s29 }
  0x19   :  { %p421_p13 = por %p420_p12, %p419_p11 }
  0x1b   :  { %p422_p0 = pnand %p421_p13, %p415_p10 }
  0x1d   :  { %425 = shalt.err (!%p422_p0)
}
  0x1e   :  { %s432_s30 = smov [#allocation7]  }
  0x1f   :  { %44 = dma.vmem_to_smem %s42_s28, 16, %s432_s30, [#allocation6]  }
  0x20   :  { %426 = dma.done.wait [#allocation4], 16  }
  0x21   :  { %427 = vsyncadd [#allocation4], 4294967280 }
  0x22   :  { %428 = dma.done.wait [#allocation6], 32  }
  0x23   :  { %429 = vsyncadd [#allocation6], 4294967264 }
  0x24   :  { %56 = sfence }
  0x25   :  { %s78_s6 = sld [smem:[#allocation5]]  ;;  %s330_s8 = sld [smem:[#allocation3 + $0x5]]  ;;  %v481_v0 = vld [vmem:[%s737_s0] sm:$0x1]  ;;  %v488_v1 = vld [vmem:[%s737_s0 + $0x1] sm:$0x1] }
  0x26   :  { %s80_s7 = sld [smem:[#allocation3]]  ;;  %s331_s9 = sld [smem:[#allocation3 + $0xa]]  ;;  %v497_v2 = vld [vmem:[%s737_s0 + $0x2] sm:$0x1]  ;;  %v511_v8 = vld [vmem:[%s737_s0 + $0x3] sm:$0x1] }
  0x27   :  { %s472_s3 = sld [smem:[#allocation3 + $0xf]]  ;;  %s474_s10 = sld [smem:[#allocation3 + $0x14]]  ;;  %v522_v11 = vld [vmem:[%s737_s0 + $0x4] sm:$0x1]  ;;  %v527_v12 = vld [vmem:[%s737_s0 + $0x5] sm:$0x1] }
  0x28   :  { %s476_s11 = sld [smem:[#allocation3 + $0x19]]  ;;  %s483_s14 = sld [smem:[#allocation3 + $0x1e]]  ;;  %v561_v27 = vld [vmem:[%s737_s0 + $0x6] sm:$0x1]  ;;  %v574_v32 = vld [vmem:[%s737_s0 + $0x7] sm:$0x1] }
  0x29   :  { %s490_s17 = sld [smem:[#allocation3 + $0x23]]  ;;  %s492_s18 = sld [smem:[#allocation3 + $0x28]]  ;;  %v609_v55 = vld [vmem:[%s737_s0 + $0x8] sm:$0x1]  ;;  %v614_v56 = vld [vmem:[%s737_s0 + $0x9] sm:$0x1] }
  0x2a   :  { %s499_s21 = sld [smem:[#allocation5 + $0x1]]  ;;  %s504_s23 = sld [smem:[#allocation3 + $0x6]] }
  0x2b   :  { %v79_v3 = vstv %s78_s6  ;;  %s501_s22 = sld [smem:[#allocation3 + $0x1]]  ;;  %v85_v6 = vstv %s330_s8  ;;  %s506_s24 = sld [smem:[#allocation3 + $0xb]] }
  0x2c   :  { %v81_v4 = vstv %s80_s7  ;;  %v89_v7 = vstv %s331_s9  ;;  %v86_v9 = vmul.f32 %v488_v1, %v85_v6  ;;  %s515_s2 = sld [smem:[#allocation3 + $0x10]]  ;;  %s517_s1 = sld [smem:[#allocation3 + $0x15]] }
  0x2d   :  { %v82_v5 = vmul.f32 %v81_v4, %v481_v0  ;;  %v93_v10 = vstv %s472_s3  ;;  %v90_v14 = vmul.f32 %v497_v2, %v89_v7  ;;  %v97_v15 = vstv %s474_s10  ;;  %s532_s6 = sld [smem:[#allocation3 + $0x1a]]  ;;  %s534_s7 = sld [smem:[#allocation3 + $0x2d]] }
  0x2e   :  { %v101_v16 = vstv %s476_s11  ;;  %s536_s8 = sld [smem:[#allocation3 + $0x1f]]  ;;  %v94_v18 = vmul.f32 %v511_v8, %v93_v10  ;;  %s539_s9 = sld [smem:[#allocation3 + $0x24]]  ;;  %v98_v19 = vmul.f32 %v522_v11, %v97_v15  ;;  %v105_v24 = vstv %s483_s14 }
  0x2f   :  { %v83_v13 = vadd.f32 %v82_v5, %v79_v3  ;;  %s541_s3 = sld [smem:[#allocation3 + $0x29]]  ;;  %v102_v20 = vmul.f32 %v527_v12, %v101_v16  ;;  %s547_s10 = sld [smem:[#allocation5 + $0x2]]  ;;  %v109_v28 = vstv %s490_s17  ;;  %v113_v37 = vstv %s492_s18 }
  0x30   :  { %v126_v21 = vstv %s499_s21  ;;  %s549_s11 = sld [smem:[#allocation3 + $0x2]]  ;;  %v132_v26 = vstv %s504_s23  ;;  %s554_s12 = sld [smem:[#allocation3 + $0x7]]  ;;  %v106_v40 = vmul.f32 %v561_v27, %v105_v24  ;;  %v110_v43 = vmul.f32 %v574_v32, %v109_v28 }
  0x31   :  { %v87_v17 = vadd.f32 %v86_v9, %v83_v13  ;;  %v128_v22 = vstv %s501_s22  ;;  %s556_s13 = sld [smem:[#allocation3 + $0xc]]  ;;  %v133_v29 = vmul.f32 %v488_v1, %v132_v26  ;;  %v136_v30 = vstv %s506_s24  ;;  %s567_s14 = sld [smem:[#allocation3 + $0x2e]] }
  0x32   :  { %v129_v25 = vmul.f32 %v128_v22, %v481_v0  ;;  %v140_v31 = vstv %s515_s2  ;;  %s569_s19 = sld [smem:[#allocation3 + $0x11]]  ;;  %v137_v35 = vmul.f32 %v497_v2, %v136_v30  ;;  %v144_v36 = vstv %s517_s1  ;;  %s578_s17 = sld [smem:[#allocation3 + $0x16]] }
  0x33   :  { %v91_v23 = vadd.f32 %v90_v14, %v87_v17  ;;  %v148_v38 = vstv %s532_s6  ;;  %v141_v42 = vmul.f32 %v511_v8, %v140_v31  ;;  %v117_v44 = vstv %s534_s7  ;;  %s588_s22 = sld [smem:[#allocation3 + $0x1b]]  ;;  %s590_s18 = sld [smem:[#allocation3 + $0x20]] }
  0x34   :  { %v130_v34 = vadd.f32 %v129_v25, %v126_v21  ;;  %v145_v45 = vmul.f32 %v522_v11, %v144_v36  ;;  %v152_v46 = vstv %s536_s8  ;;  %v149_v49 = vmul.f32 %v527_v12, %v148_v38  ;;  %s594_s23 = sld [smem:[#allocation3 + $0x25]]  ;;  %s596_s24 = sld [smem:[#allocation5 + $0x3]] }
  0x35   :  { %v95_v33 = vadd.f32 %v94_v18, %v91_v23  ;;  %v156_v50 = vstv %s539_s9  ;;  %v173_v51 = vstv %s547_s10  ;;  %s602_s25 = sld [smem:[#allocation3 + $0x3]]  ;;  %s604_s26 = sld [smem:[#allocation3 + $0x8]]  ;;  %v153_v61 = vmul.f32 %v561_v27, %v152_v46 }
  0x36   :  { %v134_v41 = vadd.f32 %v133_v29, %v130_v34  ;;  %v175_v52 = vstv %s549_s11  ;;  %v179_v53 = vstv %s554_s12  ;;  %v160_v62 = vstv %s541_s3  ;;  %s622_s29 = sld [smem:[#allocation3 + $0xd]]  ;;  %s624_s30 = sld [smem:[#allocation3 + $0x12]] }
  0x37   :  { %v99_v39 = vadd.f32 %v98_v19, %v95_v33  ;;  %v183_v54 = vstv %s556_s13  ;;  %v176_v59 = vmul.f32 %v175_v52, %v481_v0  ;;  %v180_v60 = vmul.f32 %v488_v1, %v179_v53  ;;  %s628_s0 = sld [smem:[#allocation3 + $0x2a]]  ;;  %s632_s6 = sld [smem:[#allocation3 + $0x17]] }
  0x38   :  { %v138_v48 = vadd.f32 %v137_v35, %v134_v41  ;;  %v164_v63 = vstv %s567_s14  ;;  %v187_v3 = vstv %s569_s19  ;;  %v184_v6 = vmul.f32 %v497_v2, %v183_v54  ;;  %s636_s7 = sld [smem:[#allocation3 + $0x2f]]  ;;  %s638_s8 = sld [smem:[#allocation7]] }
  0x39   :  { %v103_v47 = vadd.f32 %v102_v20, %v99_v39  ;;  %v177_v5 = vadd.f32 %v176_v59, %v173_v51  ;;  %v191_v7 = vstv %s578_s17  ;;  %v114_v10 = vmul.f32 %v609_v55, %v113_v37  ;;  %s644_s9 = sld [smem:[#allocation3 + $0x1c]]  ;;  %s651_s3 = sld [smem:[#allocation3 + $0x21]] }
  0x3a   :  { %v142_v58 = vadd.f32 %v141_v42, %v138_v48  ;;  %v118_v13 = vmul.f32 %v614_v56, %v117_v44  ;;  %v157_v15 = vmul.f32 %v574_v32, %v156_v50  ;;  %v188_v17 = vmul.f32 %v511_v8, %v187_v3  ;;  %s653_s10 = sld [smem:[#allocation3 + $0x26]]  ;;  %s657_s11 = sld [smem:[#allocation5 + $0x4]] }
  0x3b   :  { %v107_v57 = vadd.f32 %v106_v40, %v103_v47  ;;  %v181_v16 = vadd.f32 %v180_v60, %v177_v5  ;;  %v161_v18 = vmul.f32 %v609_v55, %v160_v62  ;;  %v165_v19 = vmul.f32 %v614_v56, %v164_v63  ;;  %s659_s12 = sld [smem:[#allocation3 + $0x4]]  ;;  %s665_s13 = sld [smem:[#allocation3 + $0x9]] }
  0x3c   :  { %v146_v4 = vadd.f32 %v145_v45, %v142_v58  ;;  %v192_v20 = vmul.f32 %v522_v11, %v191_v7  ;;  %v195_v21 = vstv %s588_s22  ;;  %v199_v24 = vstv %s590_s18  ;;  %s667_s15 = sld [smem:[#allocation3 + $0xe]]  ;;  %s671_s16 = sld [smem:[#allocation3 + $0x2b]] }
  0x3d   :  { %v111_v9 = vadd.f32 %v110_v43, %v107_v57  ;;  %v185_v23 = vadd.f32 %v184_v6, %v181_v16  ;;  %v203_v25 = vstv %s594_s23  ;;  %v220_v28 = vstv %s596_s24  ;;  %s675_s14 = sld [smem:[#allocation3 + $0x30]]  ;;  %s677_s19 = sld [smem:[#allocation3 + $0x13]] }
  0x3e   :  { %v150_v14 = vadd.f32 %v149_v49, %v146_v4  ;;  %v222_v29 = vstv %s602_s25  ;;  %v226_v30 = vstv %s604_s26  ;;  %v196_v34 = vmul.f32 %v527_v12, %v195_v21  ;;  %s682_s20 = sld [smem:[#allocation7 + $0x1]]  ;;  %s685_s21 = sld [smem:[#allocation3 + $0x18]] }
  0x3f   :  { %v115_v26 = vadd.f32 %v114_v10, %v111_v9  ;;  %v189_v33 = vadd.f32 %v188_v17, %v185_v23  ;;  %v223_v35 = vmul.f32 %v222_v29, %v481_v0  ;;  %v200_v36 = vmul.f32 %v561_v27, %v199_v24  ;;  %s691_s17 = sld [smem:[#allocation3 + $0x1d]]  ;;  %s699_s22 = sld [smem:[#allocation3 + $0x22]] }
  0x40   :  { %v154_v22 = vadd.f32 %v153_v61, %v150_v14  ;;  %v227_v37 = vmul.f32 %v488_v1, %v226_v30  ;;  %v230_v38 = vstv %s622_s29  ;;  %v234_v39 = vstv %s624_s30  ;;  %s708_s18 = sld [smem:[#allocation3 + $0x27]]  ;;  %s715_s25 = sld [smem:[#allocation7 + $0x2]] }
  0x41   :  { %v193_v40 = vadd.f32 %v192_v20, %v189_v33  ;;  %v204_v41 = vmul.f32 %v574_v32, %v203_v25  ;;  %v207_v42 = vstv %s628_s0  ;;  %v224_v43 = vadd.f32 %v223_v35, %v220_v28  ;;  %s718_s26 = sld [smem:[#allocation3 + $0x2c]]  ;;  %s374_s2 = sld [smem:[#allocation7 + $0x3]] }
  0x42   :  { %v158_v31 = vadd.f32 %v157_v15, %v154_v22  ;;  %v119_v44 = vadd.f32 %v118_v13, %v115_v26  ;;  %v231_v46 = vmul.f32 %v497_v2, %v230_v38  ;;  %v238_v47 = vstv %s632_s6  ;;  %s386_s1 = sld [smem:[#allocation7 + $0x4]] }
  0x43   :  { %v197_v48 = vadd.f32 %v196_v34, %v193_v40  ;;  %v211_v49 = vstv %s636_s7  ;;  %v228_v50 = vadd.f32 %v227_v37, %v224_v43  ;;  %v235_v51 = vmul.f32 %v511_v8, %v234_v39 }
  0x44   :  { %v162_v45 = vadd.f32 %v161_v18, %v158_v31  ;;  %v122_v52 = vstv %s638_s8  ;;  %v242_v53 = vstv %s644_s9  ;;  %v208_v57 = vmul.f32 %v609_v55, %v207_v42 }
  0x45   :  { %v201_v54 = vadd.f32 %v200_v36, %v197_v48  ;;  %v232_v58 = vadd.f32 %v231_v46, %v228_v50  ;;  %v239_v59 = vmul.f32 %v522_v11, %v238_v47  ;;  %v121_v60 = vmax.f32 %v119_v44, 0.0 }
  0x46   :  { %v166_v61 = vadd.f32 %v165_v19, %v162_v45  ;;  %v212_v62 = vmul.f32 %v614_v56, %v211_v49  ;;  %v246_v63 = vstv %s651_s3  ;;  %v243_v5 = vmul.f32 %v527_v12, %v242_v53 }
  0x47   :  { %v205_v3 = vadd.f32 %v204_v41, %v201_v54  ;;  %v236_v4 = vadd.f32 %v235_v51, %v232_v58  ;;  %v250_v6 = vstv %s653_s10  ;;  %v267_v7 = vstv %s657_s11 }
  0x48   :  { %v269_v9 = vstv %s659_s12  ;;  %v273_v10 = vstv %s665_s13  ;;  %v277_v13 = vstv %s667_s15  ;;  %v247_v15 = vmul.f32 %v561_v27, %v246_v63 }
  0x49   :  { %v240_v14 = vadd.f32 %v239_v59, %v236_v4  ;;  %v254_v16 = vstv %s671_s16  ;;  %v270_v17 = vmul.f32 %v269_v9, %v481_v0  ;;  %v251_v18 = vmul.f32 %v574_v32, %v250_v6 }
  0x4a   :  { %v258_v19 = vstv %s675_s14  ;;  %v274_v20 = vmul.f32 %v488_v1, %v273_v10  ;;  %v281_v21 = vstv %s677_s19  ;;  %v209_v22 = vadd.f32 %v208_v57, %v205_v3 }
  0x4b   :  { %v244_v23 = vadd.f32 %v243_v5, %v240_v14  ;;  %v271_v24 = vadd.f32 %v270_v17, %v267_v7  ;;  %v278_v25 = vmul.f32 %v497_v2, %v277_v13  ;;  %v77_v26 = vstv %s741_s4  ;;  %s385_s4 = sld [smem:[#allocation3 + $0x31]] }
  0x4c   :  { %v169_v28 = vstv %s682_s20  ;;  %v285_v0 = vstv %s685_s21  ;;  %v255_v29 = vmul.f32 %v609_v55, %v254_v16  ;;  %v282_v31 = vmul.f32 %v511_v8, %v281_v21 }
  0x4d   :  { %v248_v1 = vadd.f32 %v247_v15, %v244_v23  ;;  %v275_v30 = vadd.f32 %v274_v20, %v271_v24  ;;  %v123_v33 = vmul.f32 %v122_v52, %v121_v60  ;;  %v168_v2 = vmax.f32 %v166_v61, 0.0 }
  0x4e   :  { %v259_v34 = vmul.f32 %v614_v56, %v258_v19  ;;  %v289_v35 = vstv %s691_s17  ;;  %v213_v36 = vadd.f32 %v212_v62, %v209_v22  ;;  %v286_v39 = vmul.f32 %v522_v11, %v285_v0 }
  0x4f   :  { %v252_v37 = vadd.f32 %v251_v18, %v248_v1  ;;  %v279_v38 = vadd.f32 %v278_v25, %v275_v30  ;;  %v293_v40 = vstv %s699_s22  ;;  %v290_v8 = vmul.f32 %v527_v12, %v289_v35 }
  0x50   :  { %v124_v43 = vadd.f32 %v123_v33, %v77_v26  ;;  %v170_v44 = vmul.f32 %v169_v28, %v168_v2  ;;  %v297_v45 = vstv %s708_s18  ;;  %v215_v46 = vmax.f32 %v213_v36, 0.0 }
  0x51   :  { %v256_v41 = vadd.f32 %v255_v29, %v252_v37  ;;  %v283_v42 = vadd.f32 %v282_v31, %v279_v38  ;;  %v294_v49 = vmul.f32 %v561_v27, %v293_v40  ;;  %v216_v50 = vstv %s715_s25 }
  0x52   :  { %v301_v51 = vstv %s718_s26  ;;  %v298_v53 = vmul.f32 %v574_v32, %v297_v45  ;;  %v171_v11 = vadd.f32 %v170_v44, %v124_v43  ;;  %v305_v54 = vstv %s385_s4 }
  0x53   :  { %v260_v47 = vadd.f32 %v259_v34, %v256_v41  ;;  %v287_v48 = vadd.f32 %v286_v39, %v283_v42  ;;  %v217_v57 = vmul.f32 %v216_v50, %v215_v46  ;;  %v302_v12 = vmul.f32 %v609_v55, %v301_v51 }
  0x54   :  { %v263_v60 = vstv %s374_s2  ;;  %v306_v62 = vmul.f32 %v614_v56, %v305_v54  ;;  %v310_v5 = vstv %s386_s1 }
  0x55   :  { %v291_v52 = vadd.f32 %v290_v8, %v287_v48  ;;  %v262_v58 = vmax.f32 %v260_v47, 0.0  ;;  %v218_v63 = vadd.f32 %v217_v57, %v171_v11 }
  0x57   :  { %v295_v59 = vadd.f32 %v294_v49, %v291_v52  ;;  %v264_v3 = vmul.f32 %v263_v60, %v262_v58 }
  0x59   :  { %v299_v61 = vadd.f32 %v298_v53, %v295_v59  ;;  %v265_v6 = vadd.f32 %v264_v3, %v218_v63 }
  0x5b   :  { %v303_v27 = vadd.f32 %v302_v12, %v299_v61 }
  0x5d   :  { %v307_v4 = vadd.f32 %v306_v62, %v303_v27 }
  0x5f   :  { %v309_v7 = vmax.f32 %v307_v4, 0.0 }
  0x61   :  { %v311_v32 = vmul.f32 %v310_v5, %v309_v7 }
  0x63   :  { %v312_v9 = vadd.f32 %v311_v32, %v265_v6 }
  0x65   :  { %v313_v10 = vmax.f32 %v312_v9, 0.0 }
  0x67   :  { %314 = vst [vmem:[%s742_s5] sm:$0x1] %v313_v10 }
  0x68   :  { %319 = vsyncpa [#allocation4], 1 }
  0x69   :  { %320 = vsyncpa [#allocation6], 1 }

</bundles_post_ra>
